<compile_context>
chip_gen: v6e
topology: v6e:2x2x1
jax: 0.10.0
libtpu: 0.0.40
codegen_flags: <defaults>
</compile_context>

<pallas_src>
import numpy as np
import jax
import jax.numpy as jnp
from jax.experimental import pallas as pl
from jax.experimental.pallas import tpu as pltpu


def _nearest_selection_matrix(n_knots: int, forecast_size: int) -> jnp.ndarray:
    """One-hot S[k, j] = 1 iff PyTorch 'nearest' picks knot k for output j."""
    # PyTorch nearest (non-exact): src = floor(dst * in_size / out_size)
    idx = (np.arange(forecast_size) * n_knots) // forecast_size  # exact integer math
    sel = np.zeros((n_knots, forecast_size), dtype=np.float32)
    sel[idx, np.arange(forecast_size)] = 1.0
    return jnp.asarray(sel, dtype=jnp.bfloat16)  # 0.0 / 1.0 are exact in bf16


def _vmem_capacity_bytes() -> int:
    """Trace-time VMEM capacity query with a conservative (v7x-safe) fallback."""
    try:
        cap = getattr(pltpu.get_tpu_info(), "vmem_capacity_bytes", None)
        if cap:
            return int(cap)
    except Exception:
        pass
    return 64 << 20


def _pick_batch_tile(batch: int, per_row_bytes: int, fixed_bytes: int,
                     sublane: int, max_tile: int, vmem_budget: int) -> int:
    """Largest sublane-aligned batch tile that fits the budget AND leaves the
    grid with >=2 (ideally >=4) steps so both v7x TensorCores get work."""
    if batch >= 4 * sublane:
        min_steps = 4
    elif batch > sublane:
        min_steps = 2
    else:
        min_steps = 1
    avail = max(vmem_budget - fixed_bytes, sublane * per_row_bytes)
    tb = avail // per_row_bytes
    tb = min(tb, max_tile)
    if min_steps > 1:
        cap = -(-batch // min_steps)             # ceil(batch / min_steps)
        cap = -(-cap // sublane) * sublane       # round up to a sublane multiple
        tb = min(tb, cap)
    tb = max(sublane, (tb // sublane) * sublane)
    return batch if tb >= batch else tb          # full-dim block: no divisibility rule


def identity_basis_forward(theta: jnp.ndarray, backcast_size: int, forecast_size: int):
    """Pallas implementation of IdentityBasis.forward.

    theta: [B, backcast_size + n_knots]
    returns (backcast [B, backcast_size], forecast [B, forecast_size])
    """
    B, T = theta.shape
    n_knots = T - backcast_size
    assert n_knots > 0, "theta must contain knots after the backcast window"

    dtype = theta.dtype
    itemsize = jnp.dtype(dtype).itemsize
    sublane = 8 * max(1, 4 // itemsize)          # 8 rows for f32, 16 for bf16

    # Backcast never enters the kernel: plain XLA slice, kept lazy / fusible
    # into whatever consumes it downstream (residual subtract in N-HiTS).
    backcast = theta[:, :backcast_size]
    # Only the knots (B*K bytes) feed the kernel -- the minimum the math needs.
    knots = theta[:, backcast_size:]
    sel = _nearest_selection_matrix(n_knots, forecast_size)

    # f32 inputs: 3 exact bf16 chunks (precision=HIGHEST equivalent); bf16: 1 pass.
    n_passes = 3 if dtype == jnp.float32 else 1

    # Per-chip VMEM budget / scoped limit / max tile (review: 64 MiB on v7x,
    # 128 MiB on v5e/v6e where 512+ row tiles reach the HBM roofline).
    vmem_cap = _vmem_capacity_bytes()
    if vmem_cap >= (96 << 20):                   # v5e / v6e (128 MiB physical)
        vmem_budget, vmem_limit, max_tile = 24 << 20, 64 << 20, 4096
    else:                                        # v7x (64 MiB) or unknown
        vmem_budget, vmem_limit, max_tile = 14 << 20, 32 << 20, 2048

    # Honest footprint accounting: double-buffered streaming tiles + resident
    # sel (x2 buffers) + in-kernel f32 temporaries.
    stream_row_bytes = 2 * (n_knots + forecast_size) * itemsize      # in + out, x2 bufs
    temp_row_bytes = n_passes * n_knots * 2 + n_knots * 4 + forecast_size * 4
    per_row_bytes = stream_row_bytes + temp_row_bytes
    fixed_bytes = 2 * n_knots * forecast_size * 2                    # sel (bf16), 2 bufs

    TB = _pick_batch_tile(B, per_row_bytes, fixed_bytes, sublane, max_tile, vmem_budget)
    grid = (pl.cdiv(B, TB),)

    def kernel(knots_ref, sel_ref, forecast_ref):
        sel_v = sel_ref[...]                                        # (K, F) one-hot, resident
        if n_passes == 1:
            # bf16 knots: single exact pass (products are chunk * {0,1}, f32 acc).
            acc = jnp.dot(knots_ref[...].astype(jnp.bfloat16), sel_v,
                          preferred_element_type=jnp.float32)
        else:
            # f32 knots: exact 3-chunk bf16 split (hi+mid+lo == k exactly for
            # normal-range f32), each pass exact on the MXU, recombined in f32.
            k = knots_ref[...].astype(jnp.float32)
            hi = k.astype(jnp.bfloat16)
            r1 = k - hi.astype(jnp.float32)
            mid = r1.astype(jnp.bfloat16)
            lo = (r1 - mid.astype(jnp.float32)).astype(jnp.bfloat16)
            acc = (jnp.dot(hi, sel_v, preferred_element_type=jnp.float32)
                   + jnp.dot(mid, sel_v, preferred_element_type=jnp.float32)
                   + jnp.dot(lo, sel_v, preferred_element_type=jnp.float32))
        forecast_ref[...] = acc.astype(forecast_ref.dtype)

    cost = pl.CostEstimate(
        flops=2 * B * n_knots * forecast_size * n_passes,
        transcendentals=0,
        bytes_accessed=B * (n_knots + forecast_size) * itemsize
                       + n_knots * forecast_size * 2,
    )

    grid_spec = pltpu.PrefetchScalarGridSpec(
        num_scalar_prefetch=0,
        grid=grid,
        in_specs=[
            pl.BlockSpec((TB, n_knots), lambda i: (i, 0)),
            # Constant block index -> selection matrix DMA'd once, stays resident.
            pl.BlockSpec((n_knots, forecast_size), lambda i: (0, 0)),
        ],
        out_specs=pl.BlockSpec((TB, forecast_size), lambda i: (i, 0)),
    )

    forecast = pl.pallas_call(
        kernel,
        out_shape=jax.ShapeDtypeStruct((B, forecast_size), dtype),
        grid_spec=grid_spec,
        compiler_params=pltpu.CompilerParams(
            dimension_semantics=("parallel",),   # shards batch grid across TCs on v7x
            vmem_limit_bytes=vmem_limit,
        ),
        cost_estimate=cost,
    )(knots, sel)

    return backcast, forecast


if __name__ == "__main__":
    # Small, deterministic example consistent with the module:
    # theta = [backcast | knots]; knots get nearest-upsampled to forecast_size.
    # forecast_size not divisible by n_knots to exercise the non-uniform mapping;
    # batch=32 gives a 4-step grid so the pipeline / parallel semantics are used.
    batch = 32
    backcast_size = 24
    n_knots = 12
    forecast_size = 20
    T = backcast_size + n_knots

    key = jax.random.PRNGKey(0)
    theta = jax.random.normal(key, (batch, T), dtype=jnp.float32)

    backcast, forecast = identity_basis_forward(theta, backcast_size, forecast_size)
    jax.block_until_ready((backcast, forecast))

    # Pure-JAX/numpy reference (same semantics as torch F.interpolate 'nearest').
    theta_np = np.asarray(theta)
    ref_backcast = theta_np[:, :backcast_size]
    idx = (np.arange(forecast_size) * n_knots) // forecast_size
    ref_forecast = theta_np[:, backcast_size:][:, idx]

    assert backcast.shape == (batch, backcast_size)
    assert forecast.shape == (batch, forecast_size)
    np.testing.assert_allclose(np.asarray(backcast), ref_backcast, rtol=0, atol=0)
    # 3-chunk split is bit-exact for normal-range f32; the tiny tolerance only
    # guards against ulp-level reassociation and would still catch any bf16
    # single-pass rounding (~1e-3) if exactness regressed.
    np.testing.assert_allclose(np.asarray(forecast), ref_forecast, rtol=1e-6, atol=1e-6)

    print("KERNEL_OK")
</pallas_src>

<mosaic_0001>
module attributes {stable_mosaic.version = 11 : i64} {
  func.func @kernel(%arg0: i32, %arg1: memref<8x12xf32, #tpu.memory_space<vmem>>, %arg2: memref<12x20xbf16, #tpu.memory_space<vmem>>, %arg3: memref<8x20xf32, #tpu.memory_space<vmem>>) attributes {dimension_semantics = [#tpu.dimension_semantics<parallel>], iteration_bounds = array<i64: 4>, scalar_prefetch = 0 : i64, scratch_operands = 0 : i64, tpu.core_type = #tpu.core_type<tc>, window_params = [{transform_indices = @transform_0, window_bounds = array<i64: 8, 12>}, {pipeline_mode = #tpu.pipeline_mode<synchronous>, transform_indices = @transform_1, window_bounds = array<i64: 12, 20>}, {transform_indices = @transform_2, window_bounds = array<i64: 8, 20>}]} {
    %c0 = arith.constant 0 : index
    %c0_0 = arith.constant 0 : index
    %0 = vector.load %arg2[%c0, %c0_0] : memref<12x20xbf16, #tpu.memory_space<vmem>>, vector<12x20xbf16>
    %c0_1 = arith.constant 0 : index
    %c0_2 = arith.constant 0 : index
    %1 = vector.load %arg1[%c0_1, %c0_2] : memref<8x12xf32, #tpu.memory_space<vmem>>, vector<8x12xf32>
    %2 = arith.truncf %1 : vector<8x12xf32> to vector<8x12xbf16>
    %3 = arith.extf %2 : vector<8x12xbf16> to vector<8x12xf32>
    %4 = arith.subf %1, %3 : vector<8x12xf32>
    %5 = arith.truncf %4 : vector<8x12xf32> to vector<8x12xbf16>
    %6 = arith.extf %5 : vector<8x12xbf16> to vector<8x12xf32>
    %7 = arith.subf %4, %6 : vector<8x12xf32>
    %8 = arith.truncf %7 : vector<8x12xf32> to vector<8x12xbf16>
    %cst = arith.constant dense<0.000000e+00> : vector<8x20xf32>
    %9 = tpu.matmul %2, %0, %cst {dimension_numbers = #tpu.dot_dimension_numbers<[1], [0], [0], [1], [0, 0, 1, 1], [], []>} : vector<8x12xbf16>, vector<12x20xbf16>, vector<8x20xf32> -> vector<8x20xf32>
    %cst_3 = arith.constant dense<0.000000e+00> : vector<8x20xf32>
    %10 = tpu.matmul %5, %0, %cst_3 {dimension_numbers = #tpu.dot_dimension_numbers<[1], [0], [0], [1], [0, 0, 1, 1], [], []>} : vector<8x12xbf16>, vector<12x20xbf16>, vector<8x20xf32> -> vector<8x20xf32>
    %11 = arith.addf %9, %10 : vector<8x20xf32>
    %cst_4 = arith.constant dense<0.000000e+00> : vector<8x20xf32>
    %12 = tpu.matmul %8, %0, %cst_4 {dimension_numbers = #tpu.dot_dimension_numbers<[1], [0], [0], [1], [0, 0, 1, 1], [], []>} : vector<8x12xbf16>, vector<12x20xbf16>, vector<8x20xf32> -> vector<8x20xf32>
    %13 = arith.addf %11, %12 : vector<8x20xf32>
    %c0_5 = arith.constant 0 : index
    %c0_6 = arith.constant 0 : index
    %14 = vector.load %arg3[%c0_5, %c0_6] : memref<8x20xf32, #tpu.memory_space<vmem>>, vector<8x20xf32>
    tpu.vector_store %arg3[%c0_5, %c0_6], %13 {strides = array<i32>} : memref<8x20xf32, #tpu.memory_space<vmem>>, vector<8x20xf32>,
    return
  }
  func.func @transform_0(%arg0: i32) -> (i32, i32) {
    %c0_i32 = arith.constant 0 : i32
    %c0_i32_0 = arith.constant 0 : i32
    return %arg0, %c0_i32 : i32, i32
  }
  func.func @transform_1(%arg0: i32) -> (i32, i32) {
    %c0_i32 = arith.constant 0 : i32
    %c0_i32_0 = arith.constant 0 : i32
    %c0_i32_1 = arith.constant 0 : i32
    return %c0_i32, %c0_i32_0 : i32, i32
  }
  func.func @transform_2(%arg0: i32) -> (i32, i32) {
    %c0_i32 = arith.constant 0 : i32
    %c0_i32_0 = arith.constant 0 : i32
    return %arg0, %c0_i32 : i32, i32
  }
}

</mosaic_0001>

<bundles_post_ra>
// kernel: tpu_custom_call.1
= control target key start
LH: loop header
LB: loop body
LE: loop exit
PB: predicated region body
PF: predicated region fallthrough
CT: control target
= control target key end

     0   :  { %s418_s9 = smov 0   ;;  %s444_s0 = inlined_call_operand.vmem [shape: f32[32,12], index: 0, kind: input, shape index: {}]   ;;  %s445_s1 = inlined_call_operand.vmem [shape: bf16[12,20], index: 1, kind: input, shape index: {}]   ;;  %s446_s2 = inlined_call_operand.vmem [shape: f32[32,20], index: 2, kind: output, shape index: {}]  }
   0x1 LB: > { %s345_s10 = sadd.s32 4294967295, %s399_s9   ;;  %p349_p0 = scmp.ge.s32.totalorder %s399_s9, 1  ;;  %s399_s9 = sphi %s418_s9, %s12_s9  }
   0x2   : > { %p111_p1 = scmp.lt.s32.totalorder %s399_s9, 5 }
   0x4   : > { %p112_p2 = pnand %p349_p0, %p111_p1 }
   0x5   : > { %p131_p3 = scmp.lt.s32.totalorder (!%p112_p2), %s345_s10, 3 }
   0x6   : > { %115 = sbr.rel (%p112_p2) target bundleno = 230 (0xe6), region = 28 }
   0xb   : > { %vm159_vm0 = vcmask 1045504   ;;  %v401_v0 = vmov 0.0   ;;  %v392_v1 = vld [vmem:[%s445_s1] sm:$0x3f]   ;;  %vm402_vm1 = vmmov 0   ;;  %s448_s10 = smov (!%p131_p3, %s345_s10), 3 }
   0xc   : > { %364 = vmatprep.subr.bf16.mxu0 %v401_v0  ;;  %370 = vmatprep.subr.bf16.mxu1 %v401_v0  ;;  %v161_v2 = vsel %vm159_vm0, %v392_v1, 0  ;;  %s350_s13 = sshll.u32 %s448_s10, 3  ;;  %vm155_vm2 = vcmask 97280   ;;  %vm290_vm3 = vcmask 162816  }
   0xd   : > { %366 = vmatprep.mubr.msk.bf16.mxu0 %vm402_vm1, %v401_v0  ;;  %372 = vmatprep.mubr.msk.bf16.mxu1 %vm402_vm1, %v401_v0  ;;  %s134_s16 = scalar_lea.vmem %s444_s0, %s350_s13  ;;  %s138_s19 = scalar_lea.vmem %s446_s2, %s350_s13 }
   0xe   : > { %365 = vmatpush3.bf16.msra.mxu0 %v161_v2  ;;  %371 = vmatpush3.bf16.msra.mxu1 %v161_v2  ;;  %v142_v3 = vld [vmem:[%s134_s16] sm:$0xff] }
   0xf   : > { %376 = vmatprep.subr.bf16.mxu0 %v401_v0  ;;  %v143_v4 = vpack.c.bf16 %v142_v3, %v142_v3 }
  0x11   : > { %v144_v5 = vunpack.c.l.bf16 %v143_v4  ;;  %373 = vmatmul.mubr.msk.bf16.vlgmr.msra.gmra.mxu1 %vm155_vm2, %v143_v4 }
  0x13   : > { %v145_v6 = vsub.f32 %v142_v3, %v144_v5 }
  0x15   : > { %v146_v7 = vpack.c.bf16 %v145_v6, %v145_v6 }
  0x17   : > { %v147_v8 = vunpack.c.l.bf16 %v146_v7  ;;  %367 = vmatmul.mubr.msk.bf16.vlgmr.msra.gmra.mxu0 %vm155_vm2, %v146_v7 }
  0x18   : > { %377 = vmatpush3.bf16.msra.mxu0 %v161_v2  ;;  %378 = vmatprep.mubr.msk.bf16.mxu0 %vm402_vm1, %v401_v0 }
  0x19   : > { %v148_v9 = vsub.f32 %v145_v6, %v147_v8 }
  0x1b   : > { %v149_v10 = vpack.c.bf16 %v148_v9, %v148_v9 }
  0x1f   : > { %379 = vmatmul.mubr.msk.bf16.vlgmr.msra.gmra.mxu0 %vm155_vm2, %v149_v10 }
  0xd1   : > { %v240_v11 = vpop.f32.mrf.mxu1 }
  0xd3   : > { %v374_v12 = vpop.f32.mrf.mxu1 }
  0xd5   : > { %v243_v13 = vpop.f32.mrf.mxu1 }
  0xd7   : > { %v197_v14 = vpop.f32.mrf.mxu0  ;;  %v375_v15 = vpop.f32.mrf.mxu1 }
  0xd8   : > { %v241_v19 = vadd.f32 %v240_v11, %v197_v14 }
  0xd9   : > { %v368_v16 = vpop.f32.mrf.mxu0 }
  0xdb   : > { %v200_v17 = vpop.f32.mrf.mxu0 }
  0xdd   : > { %v369_v18 = vpop.f32.mrf.mxu0 }
  0xdf   : > { %v283_v20 = vpop.f32.mrf.mxu0 }
  0xe0   : > { %v289_v21 = vadd.f32 %v283_v20, %v241_v19 }
  0xe1   : > { %v380_v22 = vpop.f32.mrf.mxu0 }
  0xe2   : > { %291 = vst.msk [vmem:[%s138_s19] sm:$0xff] %vm290_vm3, %v289_v21 }
  0xe3   : > { %v286_v23 = vpop.f32.mrf.mxu0 }
  0xe5   : > { %v381_v24 = vpop.f32.mrf.mxu0 }
  0xe6 PF: > { %s12_s9 = sadd.s32 1, %s399_s9  }
  0xe7   : > { %p9_p4 = scmp.ge.s32.totalorder %s12_s9, 6  }
  0xe9   :  { %11 = sbr.rel (!%p9_p4) target bundleno = 1 (0x1), region = 58 }

</bundles_post_ra>
